<compile_context>
chip_gen: v7x
topology: tpu7x:2x2x1
jax: 0.10.0
libtpu: 0.0.40
codegen_flags: <defaults>
</compile_context>

<pallas_src>
import functools

import jax
import jax.numpy as jnp
from jax.experimental import pallas as pl
from jax.experimental.pallas import tpu as pltpu

_EPS = 1e-5   # nn.LayerNorm default
_LANE = 128


def _round_up(v, m):
    return (v + m - 1) // m * m


def _prenorm_linear_kernel(x_ref, w_ref, b_ref, o_ref, *, d_actual, d_padded):
    # x_ref: (tm, Dp) token tile; w_ref: (Dp, Dp) gamma-folded weight;
    # b_ref: (1, Dp) folded bias.  Padded lanes of x are zero on input.
    x = x_ref[...].astype(jnp.float32)
    inv_d = 1.0 / d_actual

    # LayerNorm statistics over the *real* D columns (biased variance, eps=1e-5).
    mean = jnp.sum(x, axis=-1, keepdims=True) * inv_d     # padded lanes are 0
    centered = x - mean
    if d_padded != d_actual:
        lane = jax.lax.broadcasted_iota(jnp.int32, x.shape, dimension=1)
        centered = jnp.where(lane < d_actual, centered, 0.0)
    var = jnp.sum(centered * centered, axis=-1, keepdims=True) * inv_d
    x_hat = centered * jax.lax.rsqrt(var + _EPS)

    # fn(norm(x)) with fn == Linear and the LN affine pre-folded into W'/b'.
    # Operands go to the MXU in the weight's native dtype, accumulate in f32.
    out = jnp.dot(x_hat.astype(w_ref.dtype), w_ref[...],
                  preferred_element_type=jnp.float32)
    out = out + b_ref[...].astype(jnp.float32)
    o_ref[...] = out.astype(o_ref.dtype)


@functools.partial(jax.jit, static_argnames=("block_rows",))
def prenorm_forward(x, gamma, beta, w, b, *, block_rows=512):
    """PreNorm forward: fn(LayerNorm(x)) with fn = Linear(D, D).

    x: (B, N, D)   gamma, beta: (D,)   w: (D, D)   b: (D,)
    """
    B, N, D = x.shape
    M = B * N
    Dp = _round_up(D, _LANE)

    sub = 8 if jnp.dtype(x.dtype).itemsize >= 4 else 16
    tm = min(_round_up(block_rows, sub), _round_up(M, sub))
    Mp = _round_up(M, tm)

    # Fold LayerNorm affine into the Linear (one-time O(D^2) outside the kernel):
    #   (x_hat*gamma + beta) @ W + b == x_hat @ (gamma[:,None]*W) + (beta@W + b)
    w_f32 = w.astype(jnp.float32)
    w_eff = (gamma.astype(jnp.float32)[:, None] * w_f32).astype(w.dtype)
    b_eff = beta.astype(jnp.float32) @ w_f32 + b.astype(jnp.float32)

    x2 = x.reshape(M, D)
    if (Mp, Dp) != (M, D):
        x2 = jnp.pad(x2, ((0, Mp - M), (0, Dp - D)))
    if Dp != D:
        w_eff = jnp.pad(w_eff, ((0, Dp - D), (0, Dp - D)))
        b_eff = jnp.pad(b_eff, ((0, Dp - D),))
    b_eff = b_eff.reshape(1, Dp)

    kernel = functools.partial(_prenorm_linear_kernel, d_actual=D, d_padded=Dp)

    # VMEM budget: double-buffered x/out tiles + resident weight/bias, 2x
    # headroom, capped at 64 MiB so it is valid on v7x as well.
    est = (2 * tm * Dp * x2.dtype.itemsize          # streamed x tiles
           + 2 * tm * Dp * x.dtype.itemsize         # streamed out tiles
           + 2 * Dp * Dp * w_eff.dtype.itemsize     # weight (constant index map)
           + 2 * Dp * b_eff.dtype.itemsize)         # bias
    vmem_limit = int(min(max(2 * est, 32 * 1024 * 1024), 64 * 1024 * 1024))
    # TODO(synk): for very large D (weight > VMEM budget) add a second grid
    # axis over output columns (w BlockSpec (Dp, tn)) instead of a resident W.

    out = pl.pallas_call(
        kernel,
        out_shape=jax.ShapeDtypeStruct((Mp, Dp), x.dtype),
        grid_spec=pltpu.PrefetchScalarGridSpec(
            num_scalar_prefetch=0,
            grid=(Mp // tm,),
            in_specs=[
                pl.BlockSpec((tm, Dp), lambda i: (i, 0)),   # x tile (streamed)
                pl.BlockSpec((Dp, Dp), lambda i: (0, 0)),   # folded weight
                pl.BlockSpec((1, Dp), lambda i: (0, 0)),    # folded bias
            ],
            out_specs=pl.BlockSpec((tm, Dp), lambda i: (i, 0)),
        ),
        compiler_params=pltpu.CompilerParams(
            dimension_semantics=("parallel",),   # megacore sharding on v7x
            vmem_limit_bytes=vmem_limit,
        ),
    )(x2, w_eff, b_eff)

    return out[:M, :D].reshape(B, N, D)


def _reference(x, gamma, beta, w, b):
    xf = x.astype(jnp.float32)
    mean = jnp.mean(xf, axis=-1, keepdims=True)
    var = jnp.mean((xf - mean) ** 2, axis=-1, keepdims=True)
    y = (xf - mean) / jnp.sqrt(var + _EPS) * gamma + beta
    return (y @ w.astype(jnp.float32) + b).astype(x.dtype)


if __name__ == "__main__":
    B, N, D = 2, 8, 32  # batch=2, seq=8, dim=32, fusion_factor=1
    key = jax.random.PRNGKey(0)
    kx, kg, kbeta, kw, kb = jax.random.split(key, 5)

    x = jax.random.normal(kx, (B, N, D), dtype=jnp.float32)
    # Non-trivial LayerNorm affine so the gamma/beta -> W'/b' fold is exercised.
    gamma = 1.0 + 0.1 * jax.random.normal(kg, (D,), dtype=jnp.float32)
    beta = 0.1 * jax.random.normal(kbeta, (D,), dtype=jnp.float32)
    # fn instantiated as Linear(D, D) with deterministic random init.
    w = jax.random.normal(kw, (D, D), dtype=jnp.float32) * 0.02
    b = jax.random.normal(kb, (D,), dtype=jnp.float32) * 0.02

    out = prenorm_forward(x, gamma, beta, w, b)
    out = jax.block_until_ready(out)

    ref = _reference(x, gamma, beta, w, b)
    assert out.shape == (B, N, D)
    assert jnp.allclose(out, ref, atol=1e-4, rtol=1e-4), "mismatch vs reference"
    print("KERNEL_OK")
</pallas_src>

<mosaic_0001>
module attributes {stable_mosaic.version = 11 : i64} {
  func.func @_prenorm_linear_kernel(%arg0: i32, %arg1: memref<16x128xf32, #tpu.memory_space<vmem>>, %arg2: memref<128x128xf32, #tpu.memory_space<vmem>>, %arg3: memref<1x128xf32, #tpu.memory_space<vmem>>, %arg4: memref<16x128xf32, #tpu.memory_space<vmem>>) attributes {dimension_semantics = [#tpu.dimension_semantics<parallel>], iteration_bounds = array<i64: 1>, scalar_prefetch = 0 : i64, scratch_operands = 0 : i64, tpu.core_type = #tpu.core_type<tc>, window_params = [{transform_indices = @transform_0, window_bounds = array<i64: 16, 128>}, {pipeline_mode = #tpu.pipeline_mode<synchronous>, transform_indices = @transform_1, window_bounds = array<i64: 128, 128>}, {pipeline_mode = #tpu.pipeline_mode<synchronous>, transform_indices = @transform_2, window_bounds = array<i64: 1, 128>}, {transform_indices = @transform_3, window_bounds = array<i64: 16, 128>}]} {
    %c0 = arith.constant 0 : index
    %c0_0 = arith.constant 0 : index
    %0 = vector.load %arg1[%c0, %c0_0] : memref<16x128xf32, #tpu.memory_space<vmem>>, vector<16x128xf32>
    %cst = arith.constant dense<0.000000e+00> : vector<16xf32>
    %1 = vector.multi_reduction <add>, %0, %cst [1] : vector<16x128xf32> to vector<16xf32>
    %2 = vector.shape_cast %1 : vector<16xf32> to vector<16x1xf32>
    %cst_1 = arith.constant 3.125000e-02 : f32
    %3 = vector.broadcast %cst_1 : f32 to vector<16x1xf32>
    %4 = arith.mulf %2, %3 : vector<16x1xf32>
    %5 = vector.broadcast %4 : vector<16x1xf32> to vector<16x128xf32>
    %6 = arith.subf %0, %5 : vector<16x128xf32>
    %7 = tpu.iota {dimensions = array<i32: 1>} : vector<16x128xi32>
    %c32_i32 = arith.constant 32 : i32
    %8 = vector.broadcast %c32_i32 : i32 to vector<16x128xi32>
    %9 = arith.cmpi slt, %7, %8 : vector<16x128xi32>
    %cst_2 = arith.constant 0.000000e+00 : f32
    %10 = vector.broadcast %cst_2 : f32 to vector<16x128xf32>
    %11 = arith.select %9, %6, %10 : vector<16x128xi1>, vector<16x128xf32>
    %12 = arith.mulf %11, %11 : vector<16x128xf32>
    %cst_3 = arith.constant dense<0.000000e+00> : vector<16xf32>
    %13 = vector.multi_reduction <add>, %12, %cst_3 [1] : vector<16x128xf32> to vector<16xf32>
    %14 = vector.shape_cast %13 : vector<16xf32> to vector<16x1xf32>
    %cst_4 = arith.constant 3.125000e-02 : f32
    %15 = vector.broadcast %cst_4 : f32 to vector<16x1xf32>
    %16 = arith.mulf %14, %15 : vector<16x1xf32>
    %cst_5 = arith.constant 9.99999974E-6 : f32
    %17 = vector.broadcast %cst_5 : f32 to vector<16x1xf32>
    %18 = arith.addf %16, %17 : vector<16x1xf32>
    %19 = math.rsqrt %18 : vector<16x1xf32>
    %20 = vector.broadcast %19 : vector<16x1xf32> to vector<16x128xf32>
    %21 = arith.mulf %11, %20 : vector<16x128xf32>
    %c0_6 = arith.constant 0 : index
    %c0_7 = arith.constant 0 : index
    %22 = vector.load %arg2[%c0_6, %c0_7] : memref<128x128xf32, #tpu.memory_space<vmem>>, vector<128x128xf32>
    %cst_8 = arith.constant dense<0.000000e+00> : vector<16x128xf32>
    %23 = tpu.matmul %21, %22, %cst_8 {dimension_numbers = #tpu.dot_dimension_numbers<[1], [0], [0], [1], [0, 0, 1, 1], [], []>} : vector<16x128xf32>, vector<128x128xf32>, vector<16x128xf32> -> vector<16x128xf32>
    %c0_9 = arith.constant 0 : index
    %c0_10 = arith.constant 0 : index
    %24 = vector.load %arg3[%c0_9, %c0_10] : memref<1x128xf32, #tpu.memory_space<vmem>>, vector<1x128xf32>
    %25 = vector.broadcast %24 : vector<1x128xf32> to vector<16x128xf32>
    %26 = arith.addf %23, %25 : vector<16x128xf32>
    %c0_11 = arith.constant 0 : index
    %c0_12 = arith.constant 0 : index
    %27 = vector.load %arg4[%c0_11, %c0_12] : memref<16x128xf32, #tpu.memory_space<vmem>>, vector<16x128xf32>
    tpu.vector_store %arg4[%c0_11, %c0_12], %26 {strides = array<i32>} : memref<16x128xf32, #tpu.memory_space<vmem>>, vector<16x128xf32>,
    return
  }
  func.func @transform_0(%arg0: i32) -> (i32, i32) {
    %c0_i32 = arith.constant 0 : i32
    %c0_i32_0 = arith.constant 0 : i32
    return %arg0, %c0_i32 : i32, i32
  }
  func.func @transform_1(%arg0: i32) -> (i32, i32) {
    %c0_i32 = arith.constant 0 : i32
    %c0_i32_0 = arith.constant 0 : i32
    %c0_i32_1 = arith.constant 0 : i32
    return %c0_i32, %c0_i32_0 : i32, i32
  }
  func.func @transform_2(%arg0: i32) -> (i32, i32) {
    %c0_i32 = arith.constant 0 : i32
    %c0_i32_0 = arith.constant 0 : i32
    %c0_i32_1 = arith.constant 0 : i32
    return %c0_i32, %c0_i32_0 : i32, i32
  }
  func.func @transform_3(%arg0: i32) -> (i32, i32) {
    %c0_i32 = arith.constant 0 : i32
    %c0_i32_0 = arith.constant 0 : i32
    return %arg0, %c0_i32 : i32, i32
  }
}

</mosaic_0001>

<bundles_post_ra>
// kernel: prenorm_forward.1
= control target key start
LH: loop header
LB: loop body
LE: loop exit
PB: predicated region body
PF: predicated region fallthrough
CT: control target
= control target key end

     0   :  { %v24_v11 = vlaneseq  ;;  %s320_s0 = inlined_call_operand.vmem [shape: f32[16,128], index: 0, kind: input, shape index: {}]   ;;  %s321_s1 = inlined_call_operand.vmem [shape: f32[128,128], index: 1, kind: input, shape index: {}]   ;;  %s322_s2 = inlined_call_operand.vmem [shape: f32[1,128], index: 2, kind: input, shape index: {}]   ;;  %s323_s3 = inlined_call_operand.vmem [shape: f32[16,128], index: 3, kind: output, shape index: {}]  }
   0x1   :  { %v14_v0 = vld [vmem:[%s320_s0] sm:$0xff]  ;;  %v15_v1 = vld [vmem:[%s320_s0 + $0x8] sm:$0xff]  ;;  %v45_v4 = vld [vmem:[%s321_s1 + $0x10] sm:$0xff] }
   0x2   :  { %16 = vadd.xlane.f32.xlu0 %v14_v0  ;;  %v43_v2 = vld [vmem:[%s321_s1] sm:$0xff]  ;;  %v44_v3 = vld [vmem:[%s321_s1 + $0x8] sm:$0xff]  ;;  %v46_v6 = vld [vmem:[%s321_s1 + $0x18] sm:$0xff]  ;;  %v25_v12 = vand.u32 127, %v24_v11 }
   0x3   :  { %v201_v5 = vpack.c.bf16 %v44_v3, %v43_v2  ;;  %v205_v7 = vpack.c.bf16 %v46_v6, %v45_v4  ;;  %v47_v8 = vld [vmem:[%s321_s1 + $0x20] sm:$0xff]  ;;  %v48_v9 = vld [vmem:[%s321_s1 + $0x28] sm:$0xff]  ;;  %v49_v23 = vld [vmem:[%s321_s1 + $0x30] sm:$0xff] }
   0x4   :  { %v209_v10 = vpack.c.bf16 %v48_v9, %v47_v8  ;;  %vm26_vm0 = vcmp.lt.s32.totalorder %v25_v12, 32  ;;  %v50_v24 = vld [vmem:[%s321_s1 + $0x38] sm:$0xff]  ;;  %v51_v26 = vld [vmem:[%s321_s1 + $0x40] sm:$0xff]  ;;  %v52_v27 = vld [vmem:[%s321_s1 + $0x48] sm:$0xff] }
   0x5   :  { %202 = vmatprep.subr.bf16.mxu0 %v201_v5  ;;  %v213_v25 = vpack.c.bf16 %v50_v24, %v49_v23  ;;  %v217_v28 = vpack.c.bf16 %v52_v27, %v51_v26  ;;  %v53_v29 = vld [vmem:[%s321_s1 + $0x50] sm:$0xff]  ;;  %v54_v30 = vld [vmem:[%s321_s1 + $0x58] sm:$0xff]  ;;  %v55_v32 = vld [vmem:[%s321_s1 + $0x60] sm:$0xff] }
   0x6   :  { %18 = vadd.xlane.f32.xlu0 %v15_v1  ;;  %204 = vmatpush3.bf16.msra.mxu0 %v201_v5  ;;  %v221_v31 = vpack.c.bf16 %v54_v30, %v53_v29  ;;  %v56_v33 = vld [vmem:[%s321_s1 + $0x68] sm:$0xff]  ;;  %v57_v34 = vld [vmem:[%s321_s1 + $0x70] sm:$0xff]  ;;  %v58_v36 = vld [vmem:[%s321_s1 + $0x78] sm:$0xff] }
   0x7   :  { %206 = vmatprep.subr.bf16.mxu0 %v205_v7  ;;  %v225_v35 = vpack.c.bf16 %v56_v33, %v55_v32  ;;  %v229_v37 = vpack.c.bf16 %v58_v36, %v57_v34  ;;  %v147_v48 = vld [vmem:[%s322_s2] ss:$0 sm:$0xff] }
   0xa   :  { %208 = vmatpush3.bf16.msra.mxu0 %v205_v7 }
   0xb   :  { %210 = vmatprep.subr.bf16.mxu0 %v209_v10 }
   0xe   :  { %212 = vmatpush3.bf16.msra.mxu0 %v209_v10 }
   0xf   :  { %214 = vmatprep.subr.bf16.mxu0 %v213_v25 }
  0x12   :  { %216 = vmatpush3.bf16.msra.mxu0 %v213_v25 }
  0x13   :  { %218 = vmatprep.subr.bf16.mxu0 %v217_v28 }
  0x16   :  { %220 = vmatpush3.bf16.msra.mxu0 %v217_v28 }
  0x17   :  { %222 = vmatprep.subr.bf16.mxu0 %v221_v31 }
  0x1a   :  { %224 = vmatpush3.bf16.msra.mxu0 %v221_v31 }
  0x1b   :  { %226 = vmatprep.subr.bf16.mxu0 %v225_v35 }
  0x1e   :  { %228 = vmatpush3.bf16.msra.mxu0 %v225_v35 }
  0x1f   :  { %230 = vmatprep.subr.bf16.mxu0 %v229_v37 }
  0x22   :  { %232 = vmatpush3.bf16.msra.mxu0 %v229_v37 }
  0x8f   :  { %v17_v13 = vpop.xlane.xlu0 %16 }
  0x90   :  { %v20_v14 = vmul.f32 0.03125, %v17_v13 }
  0x92   :  { %v22_v15 = vsub.f32 %v14_v0, %v20_v14 }
  0x93   :  { %v19_v16 = vpop.xlane.xlu0 %18 }
  0x94   :  { %v21_v17 = vmul.f32 0.03125, %v19_v16  ;;  %v27_v18 = vsel %vm26_vm0, %v22_v15, 0.0 }
  0x95   :  { %v29_v19 = vmul.f32 %v27_v18, %v27_v18 }
  0x96   :  { %v23_v20 = vsub.f32 %v15_v1, %v21_v17 }
  0x97   :  { %31 = vadd.xlane.f32.xlu1 %v29_v19 }
  0x98   :  { %v28_v21 = vsel %vm26_vm0, %v23_v20, 0.0 }
  0x99   :  { %v30_v22 = vmul.f32 %v28_v21, %v28_v21 }
  0x9b   :  { %33 = vadd.xlane.f32.xlu1 %v30_v22 }
 0x124   :  { %v32_v38 = vpop.xlane.xlu1 %31 }
 0x125   :  { %v35_v39 = vmul.f32 0.03125, %v32_v38 }
 0x127   :  { %v37_v40 = vadd.f32 1e-05, %v35_v39 }
 0x128   :  { %v34_v41 = vpop.xlane.xlu1 %33 }
 0x129   :  { %233 = vrsqrt.f32 %v37_v40  ;;  %v36_v42 = vmul.f32 0.03125, %v34_v41 }
 0x12b   :  { %v38_v43 = vadd.f32 1e-05, %v36_v42 }
 0x12d   :  { %235 = vrsqrt.f32 %v38_v43 }
 0x133   :  { %v234_v44 = vpop.eup %233 }
 0x134   :  { %v41_v45 = vmul.f32 %v234_v44, %v27_v18 }
 0x136   :  { %198 = vmatprep.mubr.f32.mxu0 %v41_v45 }
 0x137   :  { %v236_v46 = vpop.eup %235 }
 0x138   :  { %v42_v47 = vmul.f32 %v236_v46, %v28_v21 }
 0x13a   :  { %199 = vmatmul.mubr.f32.vlgmr.msra.gmra.mrb[0].mxu0 %v42_v47 }
 0x20d   :  { %v200_v49 = vpop.f32.mrb[0].mxu0 }
 0x20e   :  { %v138_v50 = vadd.f32 %v200_v49, %v147_v48  ;;  %v132_v51 = vpop.f32.mrb[1].mxu0 }
 0x20f   :  { %v133_v52 = vadd.f32 %v147_v48, %v132_v51 }
 0x210   :  { %142 = vst [vmem:[%s323_s3 + $0x8] sm:$0xff] %v138_v50 }
 0x211   :  { %141 = vst [vmem:[%s323_s3] sm:$0xff] %v133_v52 }

</bundles_post_ra>
